<compile_context>
chip_gen: v7x
topology: tpu7x:2x2x1
jax: 0.10.0
libtpu: 0.0.40
codegen_flags: <defaults>
</compile_context>

<pallas_src>
import functools

import jax
import jax.numpy as jnp
from jax.experimental import pallas as pl
from jax.experimental.pallas import tpu as pltpu

DROPOUT_RATES_TRAIN = (0.1, 0.2, 0.3, 0.4, 0.5)
DROPOUT_RATES_EVAL = (0.0, 0.0, 0.0, 0.0, 0.0)


def _multi_dropout_head_kernel(seed_ref, x_ref, w_ref, b_ref, o_ref, *, rates):
    """seed: SMEM (1,) int32; x: (TB,H) f32; w: (H,Cp) f32; b: (1,Cp); o: (TB,Cp)."""
    x = x_ref[...].astype(jnp.float32)          # (TB, H)
    w = w_ref[...].astype(jnp.float32)          # (H, Cp)
    b = b_ref[...].astype(jnp.float32)          # (1, Cp)
    tb, h = x_ref.shape

    if any(p > 0.0 for p in rates):
        # Per-element global counter: (global_row * H + col), used as the
        # per-element stream position of a counter-based hash PRNG.
        base_row = pl.program_id(0) * tb
        rows = jax.lax.broadcasted_iota(jnp.int32, (tb, h), 0) + base_row
        cols = jax.lax.broadcasted_iota(jnp.int32, (tb, h), 1)
        idx = (rows * jnp.int32(h) + cols).astype(jnp.uint32)
        seed = seed_ref[0].astype(jnp.uint32)

        # Accumulate the keep-scale of the 5 dropout samples (linearity fold):
        #   scale_sum = sum_i where(keep_i, 1/(1-p_i), 0)
        scale_sum = jnp.zeros((tb, h), jnp.float32)
        for i, p in enumerate(rates):
            if p <= 0.0:
                scale_sum = scale_sum + jnp.float32(1.0)
                continue
            # splitmix/murmur-style integer finalizer, decorrelated per sample i.
            z = idx + seed + jnp.uint32(((i + 1) * 0x9E3779B9) & 0xFFFFFFFF)
            z = (z ^ (z >> jnp.uint32(16))) * jnp.uint32(0x7FEB352D)
            z = (z ^ (z >> jnp.uint32(15))) * jnp.uint32(0x846CA68B)
            z = z ^ (z >> jnp.uint32(16))
            # Integer-threshold dropout: keep iff low 23 random bits >= p * 2^23.
            thr = jnp.uint32(int(round(p * float(1 << 23))))
            keep = (z & jnp.uint32(0x7FFFFF)) >= thr
            scale_sum = scale_sum + jnp.where(
                keep, jnp.float32(1.0 / (1.0 - p)), jnp.float32(0.0))

        xm = x * (scale_sum * jnp.float32(1.0 / len(rates)))
    else:
        # Eval: dropout is identity; mean of 5 identical samples == single Linear.
        xm = x

    # Single MXU matmul + bias (exactly equivalent to averaging 5 matmuls).
    o_ref[...] = jnp.dot(xm, w, preferred_element_type=jnp.float32) + b


def prepare_head_params(weight, bias):
    """One-time prep: pad classes to a 128-lane slab. weight: (H, C), bias: (C,)."""
    H, C = weight.shape
    c_pad = max(128, ((C + 127) // 128) * 128)
    w_p = jnp.zeros((H, c_pad), jnp.float32).at[:, :C].set(weight.astype(jnp.float32))
    b_p = jnp.zeros((1, c_pad), jnp.float32).at[0, :C].set(bias.astype(jnp.float32))
    return w_p, b_p, C


def multi_dropout_linear(x, w_pad, b_pad, num_classes, seed, *, training=True):
    """x: (B, H) f32; w_pad: (H, Cp); b_pad: (1, Cp) -> logits (B, num_classes)."""
    B, H = x.shape
    c_pad = w_pad.shape[1]
    rates = DROPOUT_RATES_TRAIN if training else DROPOUT_RATES_EVAL

    # Pad batch to a full 8-sublane tile; choose a batch tile so the grid can
    # shard across TensorCores when B grows.
    if B <= 128:
        b_pad_rows = max(8, ((B + 7) // 8) * 8)
        tb = b_pad_rows
    else:
        tb = 128
        b_pad_rows = ((B + tb - 1) // tb) * tb
    if b_pad_rows != B:
        x = jnp.pad(x, ((0, b_pad_rows - B), (0, 0)))

    seed_arr = jnp.asarray([seed], dtype=jnp.int32)
    kernel = functools.partial(_multi_dropout_head_kernel, rates=rates)

    out_p = pl.pallas_call(
        kernel,
        grid=(b_pad_rows // tb,),
        out_shape=jax.ShapeDtypeStruct((b_pad_rows, c_pad), jnp.float32),
        in_specs=[
            pl.BlockSpec(memory_space=pltpu.MemorySpace.SMEM),          # seed
            pl.BlockSpec((tb, H), lambda i: (i, 0)),                    # x
            pl.BlockSpec((H, c_pad), lambda i: (0, 0)),                 # weight
            pl.BlockSpec((1, c_pad), lambda i: (0, 0)),                 # bias
        ],
        out_specs=pl.BlockSpec((tb, c_pad), lambda i: (i, 0)),
        compiler_params=pltpu.CompilerParams(
            dimension_semantics=("parallel",)),
    )(seed_arr, x, w_pad, b_pad)

    return out_p[:B, :num_classes]


if __name__ == "__main__":
    # Small, module-consistent shapes: batch=4 (cfg.batch_size), hidden=256
    # (stand-in for deberta-v3-large hidden_size=1024), num_classes=3
    # (Ineffective / Adequate / Effective).
    B, H, C = 4, 256, 3
    initializer_range = 0.02

    key = jax.random.PRNGKey(0)
    k_x, k_w = jax.random.split(key)

    # Synthetic pooled CLS hidden state (what the backbone would output).
    sequence_output = jax.random.normal(k_x, (B, H), dtype=jnp.float32)

    # Linear parameters initialized like Model._init_weights:
    #   weight ~ N(0, initializer_range), bias = 0.
    # (Stored as (H, C), i.e. transposed vs torch's (C, H); same linear map.)
    weight = initializer_range * jax.random.normal(k_w, (H, C), dtype=jnp.float32)
    bias = jnp.zeros((C,), dtype=jnp.float32)

    # One-time parameter prep (padding hoisted out of the per-call path).
    w_pad, b_pad, num_classes = prepare_head_params(weight, bias)

    # Training-mode forward: 5 multi-sample dropouts folded + single matmul.
    out_train = multi_dropout_linear(sequence_output, w_pad, b_pad, num_classes,
                                     seed=3655, training=True)
    out_train = jax.block_until_ready(out_train)
    assert out_train.shape == (B, C)
    assert bool(jnp.all(jnp.isfinite(out_train)))

    # Eval-mode forward (dropout = identity): must equal a plain Linear.
    out_eval = multi_dropout_linear(sequence_output, w_pad, b_pad, num_classes,
                                    seed=3655, training=False)
    out_eval = jax.block_until_ready(out_eval)
    ref_eval = sequence_output @ weight + bias[None, :]
    assert out_eval.shape == (B, C)
    assert jnp.allclose(out_eval, ref_eval, atol=1e-4, rtol=1e-4)

    print("KERNEL_OK")
</pallas_src>

<mosaic_0001>
module attributes {stable_mosaic.version = 11 : i64} {
  func.func @_multi_dropout_head_kernel(%arg0: i32, %arg1: memref<1xi32, #tpu.memory_space<smem>>, %arg2: memref<8x256xf32, #tpu.memory_space<vmem>>, %arg3: memref<256x128xf32, #tpu.memory_space<vmem>>, %arg4: memref<1x128xf32, #tpu.memory_space<vmem>>, %arg5: memref<8x128xf32, #tpu.memory_space<vmem>>) attributes {dimension_semantics = [#tpu.dimension_semantics<parallel>], iteration_bounds = array<i64: 1>, scalar_prefetch = 0 : i64, scratch_operands = 0 : i64, tpu.core_type = #tpu.core_type<tc>, window_params = [{transform_indices = @transform_0, window_bounds = array<i64: 1>}, {transform_indices = @transform_1, window_bounds = array<i64: 8, 256>}, {pipeline_mode = #tpu.pipeline_mode<synchronous>, transform_indices = @transform_2, window_bounds = array<i64: 256, 128>}, {pipeline_mode = #tpu.pipeline_mode<synchronous>, transform_indices = @transform_3, window_bounds = array<i64: 1, 128>}, {transform_indices = @transform_4, window_bounds = array<i64: 8, 128>}]} {
    %c0 = arith.constant 0 : index
    %c0_0 = arith.constant 0 : index
    %0 = vector.load %arg2[%c0, %c0_0] : memref<8x256xf32, #tpu.memory_space<vmem>>, vector<8x256xf32>
    %c0_1 = arith.constant 0 : index
    %c0_2 = arith.constant 0 : index
    %1 = vector.load %arg3[%c0_1, %c0_2] : memref<256x128xf32, #tpu.memory_space<vmem>>, vector<256x128xf32>
    %c0_3 = arith.constant 0 : index
    %c0_4 = arith.constant 0 : index
    %2 = vector.load %arg4[%c0_3, %c0_4] : memref<1x128xf32, #tpu.memory_space<vmem>>, vector<1x128xf32>
    %c8_i32 = arith.constant 8 : i32
    %3 = arith.muli %arg0, %c8_i32 : i32
    %4 = tpu.iota {dimensions = array<i32: 0>} : vector<8x256xi32>
    %5 = vector.broadcast %3 : i32 to vector<8x256xi32>
    %6 = arith.addi %4, %5 : vector<8x256xi32>
    %7 = tpu.iota {dimensions = array<i32: 1>} : vector<8x256xi32>
    %c256_i32 = arith.constant 256 : i32
    %8 = vector.broadcast %c256_i32 : i32 to vector<8x256xi32>
    %9 = arith.muli %6, %8 : vector<8x256xi32>
    %10 = arith.addi %9, %7 : vector<8x256xi32>
    %c0_5 = arith.constant 0 : index
    %11 = memref.load %arg1[%c0_5] : memref<1xi32, #tpu.memory_space<smem>>
    %cst = arith.constant 0.000000e+00 : f32
    %12 = vector.broadcast %cst : f32 to vector<8x256xf32>
    %13 = vector.broadcast %11 : i32 to vector<8x256xi32>
    %14 = arith.addi %10, %13 : vector<8x256xi32>
    %c-1640531527_i32 = arith.constant -1640531527 : i32
    %15 = vector.broadcast %c-1640531527_i32 : i32 to vector<8x256xi32>
    %16 = arith.addi %14, %15 : vector<8x256xi32>
    %c16_i32 = arith.constant 16 : i32
    %17 = vector.broadcast %c16_i32 : i32 to vector<8x256xi32>
    %18 = arith.shrui %16, %17 : vector<8x256xi32>
    %19 = arith.xori %16, %18 : vector<8x256xi32>
    %c2146121005_i32 = arith.constant 2146121005 : i32
    %20 = vector.broadcast %c2146121005_i32 : i32 to vector<8x256xi32>
    %21 = arith.muli %19, %20 : vector<8x256xi32>
    %c15_i32 = arith.constant 15 : i32
    %22 = vector.broadcast %c15_i32 : i32 to vector<8x256xi32>
    %23 = arith.shrui %21, %22 : vector<8x256xi32>
    %24 = arith.xori %21, %23 : vector<8x256xi32>
    %c-2073254261_i32 = arith.constant -2073254261 : i32
    %25 = vector.broadcast %c-2073254261_i32 : i32 to vector<8x256xi32>
    %26 = arith.muli %24, %25 : vector<8x256xi32>
    %c16_i32_6 = arith.constant 16 : i32
    %27 = vector.broadcast %c16_i32_6 : i32 to vector<8x256xi32>
    %28 = arith.shrui %26, %27 : vector<8x256xi32>
    %29 = arith.xori %26, %28 : vector<8x256xi32>
    %c8388607_i32 = arith.constant 8388607 : i32
    %30 = vector.broadcast %c8388607_i32 : i32 to vector<8x256xi32>
    %31 = arith.andi %29, %30 : vector<8x256xi32>
    %c838861_i32 = arith.constant 838861 : i32
    %32 = vector.broadcast %c838861_i32 : i32 to vector<8x256xi32>
    %33 = arith.cmpi uge, %31, %32 : vector<8x256xi32>
    %cst_7 = arith.constant 1.11111116 : f32
    %cst_8 = arith.constant 0.000000e+00 : f32
    %34 = vector.broadcast %cst_7 : f32 to vector<8x256xf32>
    %35 = vector.broadcast %cst_8 : f32 to vector<8x256xf32>
    %36 = arith.select %33, %34, %35 : vector<8x256xi1>, vector<8x256xf32>
    %37 = arith.addf %12, %36 : vector<8x256xf32>
    %38 = vector.broadcast %11 : i32 to vector<8x256xi32>
    %39 = arith.addi %10, %38 : vector<8x256xi32>
    %c1013904242_i32 = arith.constant 1013904242 : i32
    %40 = vector.broadcast %c1013904242_i32 : i32 to vector<8x256xi32>
    %41 = arith.addi %39, %40 : vector<8x256xi32>
    %c16_i32_9 = arith.constant 16 : i32
    %42 = vector.broadcast %c16_i32_9 : i32 to vector<8x256xi32>
    %43 = arith.shrui %41, %42 : vector<8x256xi32>
    %44 = arith.xori %41, %43 : vector<8x256xi32>
    %c2146121005_i32_10 = arith.constant 2146121005 : i32
    %45 = vector.broadcast %c2146121005_i32_10 : i32 to vector<8x256xi32>
    %46 = arith.muli %44, %45 : vector<8x256xi32>
    %c15_i32_11 = arith.constant 15 : i32
    %47 = vector.broadcast %c15_i32_11 : i32 to vector<8x256xi32>
    %48 = arith.shrui %46, %47 : vector<8x256xi32>
    %49 = arith.xori %46, %48 : vector<8x256xi32>
    %c-2073254261_i32_12 = arith.constant -2073254261 : i32
    %50 = vector.broadcast %c-2073254261_i32_12 : i32 to vector<8x256xi32>
    %51 = arith.muli %49, %50 : vector<8x256xi32>
    %c16_i32_13 = arith.constant 16 : i32
    %52 = vector.broadcast %c16_i32_13 : i32 to vector<8x256xi32>
    %53 = arith.shrui %51, %52 : vector<8x256xi32>
    %54 = arith.xori %51, %53 : vector<8x256xi32>
    %c8388607_i32_14 = arith.constant 8388607 : i32
    %55 = vector.broadcast %c8388607_i32_14 : i32 to vector<8x256xi32>
    %56 = arith.andi %54, %55 : vector<8x256xi32>
    %c1677722_i32 = arith.constant 1677722 : i32
    %57 = vector.broadcast %c1677722_i32 : i32 to vector<8x256xi32>
    %58 = arith.cmpi uge, %56, %57 : vector<8x256xi32>
    %cst_15 = arith.constant 1.250000e+00 : f32
    %cst_16 = arith.constant 0.000000e+00 : f32
    %59 = vector.broadcast %cst_15 : f32 to vector<8x256xf32>
    %60 = vector.broadcast %cst_16 : f32 to vector<8x256xf32>
    %61 = arith.select %58, %59, %60 : vector<8x256xi1>, vector<8x256xf32>
    %62 = arith.addf %37, %61 : vector<8x256xf32>
    %63 = vector.broadcast %11 : i32 to vector<8x256xi32>
    %64 = arith.addi %10, %63 : vector<8x256xi32>
    %c-626627285_i32 = arith.constant -626627285 : i32
    %65 = vector.broadcast %c-626627285_i32 : i32 to vector<8x256xi32>
    %66 = arith.addi %64, %65 : vector<8x256xi32>
    %c16_i32_17 = arith.constant 16 : i32
    %67 = vector.broadcast %c16_i32_17 : i32 to vector<8x256xi32>
    %68 = arith.shrui %66, %67 : vector<8x256xi32>
    %69 = arith.xori %66, %68 : vector<8x256xi32>
    %c2146121005_i32_18 = arith.constant 2146121005 : i32
    %70 = vector.broadcast %c2146121005_i32_18 : i32 to vector<8x256xi32>
    %71 = arith.muli %69, %70 : vector<8x256xi32>
    %c15_i32_19 = arith.constant 15 : i32
    %72 = vector.broadcast %c15_i32_19 : i32 to vector<8x256xi32>
    %73 = arith.shrui %71, %72 : vector<8x256xi32>
    %74 = arith.xori %71, %73 : vector<8x256xi32>
    %c-2073254261_i32_20 = arith.constant -2073254261 : i32
    %75 = vector.broadcast %c-2073254261_i32_20 : i32 to vector<8x256xi32>
    %76 = arith.muli %74, %75 : vector<8x256xi32>
    %c16_i32_21 = arith.constant 16 : i32
    %77 = vector.broadcast %c16_i32_21 : i32 to vector<8x256xi32>
    %78 = arith.shrui %76, %77 : vector<8x256xi32>
    %79 = arith.xori %76, %78 : vector<8x256xi32>
    %c8388607_i32_22 = arith.constant 8388607 : i32
    %80 = vector.broadcast %c8388607_i32_22 : i32 to vector<8x256xi32>
    %81 = arith.andi %79, %80 : vector<8x256xi32>
    %c2516582_i32 = arith.constant 2516582 : i32
    %82 = vector.broadcast %c2516582_i32 : i32 to vector<8x256xi32>
    %83 = arith.cmpi uge, %81, %82 : vector<8x256xi32>
    %cst_23 = arith.constant 1.42857146 : f32
    %cst_24 = arith.constant 0.000000e+00 : f32
    %84 = vector.broadcast %cst_23 : f32 to vector<8x256xf32>
    %85 = vector.broadcast %cst_24 : f32 to vector<8x256xf32>
    %86 = arith.select %83, %84, %85 : vector<8x256xi1>, vector<8x256xf32>
    %87 = arith.addf %62, %86 : vector<8x256xf32>
    %88 = vector.broadcast %11 : i32 to vector<8x256xi32>
    %89 = arith.addi %10, %88 : vector<8x256xi32>
    %c2027808484_i32 = arith.constant 2027808484 : i32
    %90 = vector.broadcast %c2027808484_i32 : i32 to vector<8x256xi32>
    %91 = arith.addi %89, %90 : vector<8x256xi32>
    %c16_i32_25 = arith.constant 16 : i32
    %92 = vector.broadcast %c16_i32_25 : i32 to vector<8x256xi32>
    %93 = arith.shrui %91, %92 : vector<8x256xi32>
    %94 = arith.xori %91, %93 : vector<8x256xi32>
    %c2146121005_i32_26 = arith.constant 2146121005 : i32
    %95 = vector.broadcast %c2146121005_i32_26 : i32 to vector<8x256xi32>
    %96 = arith.muli %94, %95 : vector<8x256xi32>
    %c15_i32_27 = arith.constant 15 : i32
    %97 = vector.broadcast %c15_i32_27 : i32 to vector<8x256xi32>
    %98 = arith.shrui %96, %97 : vector<8x256xi32>
    %99 = arith.xori %96, %98 : vector<8x256xi32>
    %c-2073254261_i32_28 = arith.constant -2073254261 : i32
    %100 = vector.broadcast %c-2073254261_i32_28 : i32 to vector<8x256xi32>
    %101 = arith.muli %99, %100 : vector<8x256xi32>
    %c16_i32_29 = arith.constant 16 : i32
    %102 = vector.broadcast %c16_i32_29 : i32 to vector<8x256xi32>
    %103 = arith.shrui %101, %102 : vector<8x256xi32>
    %104 = arith.xori %101, %103 : vector<8x256xi32>
    %c8388607_i32_30 = arith.constant 8388607 : i32
    %105 = vector.broadcast %c8388607_i32_30 : i32 to vector<8x256xi32>
    %106 = arith.andi %104, %105 : vector<8x256xi32>
    %c3355443_i32 = arith.constant 3355443 : i32
    %107 = vector.broadcast %c3355443_i32 : i32 to vector<8x256xi32>
    %108 = arith.cmpi uge, %106, %107 : vector<8x256xi32>
    %cst_31 = arith.constant 1.66666663 : f32
    %cst_32 = arith.constant 0.000000e+00 : f32
    %109 = vector.broadcast %cst_31 : f32 to vector<8x256xf32>
    %110 = vector.broadcast %cst_32 : f32 to vector<8x256xf32>
    %111 = arith.select %108, %109, %110 : vector<8x256xi1>, vector<8x256xf32>
    %112 = arith.addf %87, %111 : vector<8x256xf32>
    %113 = vector.broadcast %11 : i32 to vector<8x256xi32>
    %114 = arith.addi %10, %113 : vector<8x256xi32>
    %c387276957_i32 = arith.constant 387276957 : i32
    %115 = vector.broadcast %c387276957_i32 : i32 to vector<8x256xi32>
    %116 = arith.addi %114, %115 : vector<8x256xi32>
    %c16_i32_33 = arith.constant 16 : i32
    %117 = vector.broadcast %c16_i32_33 : i32 to vector<8x256xi32>
    %118 = arith.shrui %116, %117 : vector<8x256xi32>
    %119 = arith.xori %116, %118 : vector<8x256xi32>
    %c2146121005_i32_34 = arith.constant 2146121005 : i32
    %120 = vector.broadcast %c2146121005_i32_34 : i32 to vector<8x256xi32>
    %121 = arith.muli %119, %120 : vector<8x256xi32>
    %c15_i32_35 = arith.constant 15 : i32
    %122 = vector.broadcast %c15_i32_35 : i32 to vector<8x256xi32>
    %123 = arith.shrui %121, %122 : vector<8x256xi32>
    %124 = arith.xori %121, %123 : vector<8x256xi32>
    %c-2073254261_i32_36 = arith.constant -2073254261 : i32
    %125 = vector.broadcast %c-2073254261_i32_36 : i32 to vector<8x256xi32>
    %126 = arith.muli %124, %125 : vector<8x256xi32>
    %c16_i32_37 = arith.constant 16 : i32
    %127 = vector.broadcast %c16_i32_37 : i32 to vector<8x256xi32>
    %128 = arith.shrui %126, %127 : vector<8x256xi32>
    %129 = arith.xori %126, %128 : vector<8x256xi32>
    %c8388607_i32_38 = arith.constant 8388607 : i32
    %130 = vector.broadcast %c8388607_i32_38 : i32 to vector<8x256xi32>
    %131 = arith.andi %129, %130 : vector<8x256xi32>
    %c4194304_i32 = arith.constant 4194304 : i32
    %132 = vector.broadcast %c4194304_i32 : i32 to vector<8x256xi32>
    %133 = arith.cmpi uge, %131, %132 : vector<8x256xi32>
    %cst_39 = arith.constant 2.000000e+00 : f32
    %cst_40 = arith.constant 0.000000e+00 : f32
    %134 = vector.broadcast %cst_39 : f32 to vector<8x256xf32>
    %135 = vector.broadcast %cst_40 : f32 to vector<8x256xf32>
    %136 = arith.select %133, %134, %135 : vector<8x256xi1>, vector<8x256xf32>
    %137 = arith.addf %112, %136 : vector<8x256xf32>
    %cst_41 = arith.constant 2.000000e-01 : f32
    %138 = vector.broadcast %cst_41 : f32 to vector<8x256xf32>
    %139 = arith.mulf %137, %138 : vector<8x256xf32>
    %140 = arith.mulf %0, %139 : vector<8x256xf32>
    %cst_42 = arith.constant dense<0.000000e+00> : vector<8x128xf32>
    %141 = tpu.matmul %140, %1, %cst_42 {dimension_numbers = #tpu.dot_dimension_numbers<[1], [0], [0], [1], [0, 0, 1, 1], [], []>} : vector<8x256xf32>, vector<256x128xf32>, vector<8x128xf32> -> vector<8x128xf32>
    %142 = vector.broadcast %2 : vector<1x128xf32> to vector<8x128xf32>
    %143 = arith.addf %141, %142 : vector<8x128xf32>
    %c0_43 = arith.constant 0 : index
    %c0_44 = arith.constant 0 : index
    %144 = vector.load %arg5[%c0_43, %c0_44] : memref<8x128xf32, #tpu.memory_space<vmem>>, vector<8x128xf32>
    tpu.vector_store %arg5[%c0_43, %c0_44], %143 {strides = array<i32>} : memref<8x128xf32, #tpu.memory_space<vmem>>, vector<8x128xf32>,
    return
  }
  func.func @transform_0(%arg0: i32) -> i32 {
    %c0_i32 = arith.constant 0 : i32
    %c0_i32_0 = arith.constant 0 : i32
    return %c0_i32 : i32
  }
  func.func @transform_1(%arg0: i32) -> (i32, i32) {
    %c0_i32 = arith.constant 0 : i32
    %c0_i32_0 = arith.constant 0 : i32
    return %arg0, %c0_i32 : i32, i32
  }
  func.func @transform_2(%arg0: i32) -> (i32, i32) {
    %c0_i32 = arith.constant 0 : i32
    %c0_i32_0 = arith.constant 0 : i32
    %c0_i32_1 = arith.constant 0 : i32
    return %c0_i32, %c0_i32_0 : i32, i32
  }
  func.func @transform_3(%arg0: i32) -> (i32, i32) {
    %c0_i32 = arith.constant 0 : i32
    %c0_i32_0 = arith.constant 0 : i32
    %c0_i32_1 = arith.constant 0 : i32
    return %c0_i32, %c0_i32_0 : i32, i32
  }
  func.func @transform_4(%arg0: i32) -> (i32, i32) {
    %c0_i32 = arith.constant 0 : i32
    %c0_i32_0 = arith.constant 0 : i32
    return %arg0, %c0_i32 : i32, i32
  }
}

</mosaic_0001>

<bundles_post_ra>
// kernel: tpu_custom_call.1
= control target key start
LH: loop header
LB: loop body
LE: loop exit
PB: predicated region body
PF: predicated region fallthrough
CT: control target
= control target key end

     0   :  { %10 = vsyncpa [#allocation4], 0  ;;  %s610_s0 = inlined_call_operand.<no memory space> [shape: s32[1], index: 0, kind: input, shape index: {}]   ;;  %s611_s1 = inlined_call_operand.hbm [shape: f32[8,256], index: 1, kind: input, shape index: {}]   ;;  %s612_s2 = inlined_call_operand.hbm [shape: f32[256,128], index: 2, kind: input, shape index: {}]   ;;  %s613_s3 = inlined_call_operand.vmem [shape: f32[1,128], index: 3, kind: input, shape index: {}]   ;;  %s614_s4 = inlined_call_operand.hbm [shape: f32[8,128], index: 4, kind: output, shape index: {}]  }
   0x1   :  { %11 = vsyncpa [#allocation7], 0 }
   0x2   :  { %12 = vsyncpa [#allocation5], 0  ;;  %s468_s15 = smov [#allocation3]   ;;  %s469_s17 = smov [#allocation6]  }
   0x3   :  { %s21_s16 = sshll.u32 %s468_s15, 4  ;;  %s30_s18 = sshll.u32 %s469_s17, 4  ;;  %s22_s16 = int_to_ptr.vmem [resolvable:$true] %s21_s16  ;;  %s499_s18 = int_to_ptr.vmem [resolvable:$true] %s30_s18 }
   0x4   :  { %s396_s21 = scalar_lea.hbm %s611_s1, 256 }
   0x5   :  { %p397_p0 = scmp.ne.s32.totalorder %s611_s1, %s396_s21  ;;  %p400_p1 = scmp.lt.u32.totalorder %s396_s21, %s611_s1 }
   0x7   :  { %p402_p2 = pnand %p400_p1, %p397_p0 }
   0x9   :  { %405 = shalt.err (!%p402_p2)
}
   0xa   :  { %s406_s26 = scalar_lea.vmem %s22_s16, 256  ;;  %p411_p4 = scmp.lt.s32.totalorder %s22_s16, %s22_s16 }
   0xb   :  { %p407_p3 = scmp.ne.s32.totalorder %s22_s16, %s406_s26  ;;  %p412_p5 = scmp.lt.s32.totalorder %s406_s26, %s406_s26 }
   0xd   :  { %p413_p6 = por %p412_p5, %p411_p4 }
   0xf   :  { %p414_p7 = pnand %p413_p6, %p407_p3 }
  0x11   :  { %417 = shalt.err (!%p414_p7)
}
  0x12   :  { %24 = dma.hbm_to_vmem [thread:$0]  %s611_s1, 256, %s22_s16, [#allocation4]  }
  0x13   :  { %s418_s5 = scalar_lea.hbm %s612_s2, 4096 }
  0x14   :  { %p419_p8 = scmp.ne.s32.totalorder %s612_s2, %s418_s5  ;;  %p422_p9 = scmp.lt.u32.totalorder %s418_s5, %s612_s2 }
  0x16   :  { %p424_p10 = pnand %p422_p9, %p419_p8 }
  0x18   :  { %427 = shalt.err (!%p424_p10)
}
  0x19   :  { %s428_s10 = scalar_lea.vmem %s499_s18, 4096  ;;  %p433_p12 = scmp.lt.s32.totalorder %s499_s18, %s499_s18 }
  0x1a   :  { %p429_p11 = scmp.ne.s32.totalorder %s499_s18, %s428_s10  ;;  %p434_p13 = scmp.lt.s32.totalorder %s428_s10, %s428_s10 }
  0x1c   :  { %p435_p0 = por %p434_p13, %p433_p12 }
  0x1e   :  { %p436_p1 = pnand %p435_p0, %p429_p11 }
  0x20   :  { %439 = shalt.err (!%p436_p1)
}
  0x21   :  { %s470_s1 = smov 128   ;;  %s471_s11 = smov 8  }
  0x22   :  { %36 = dma.hbm_to_vmem [thread:$0]  %s612_s2, 4096, %s499_s18, [#allocation7], %s470_s1, %s470_s1, %s471_s11  }
  0x23   :  { %462 = dma.done.wait [#allocation4], 256  }
  0x24   :  { %463 = vsyncadd [#allocation4], 4294967040 }
  0x25   :  { %464 = dma.done.wait [#allocation7], 4096  }
  0x26   :  { %465 = vsyncadd [#allocation7], 4294963200  ;;  %v81_v0 = vlaneseq  ;;  %v92_v5 = vstv %s610_s0  ;;  %v63_v7 = vld [vmem:[#allocation6 + $0x80] sm:$0xff]  ;;  %v64_v8 = vld [vmem:[#allocation6 + $0x88] sm:$0xff]  ;;  %s473_s16 = smov [#allocation8]  }
  0x27   :  { %v47_v9 = vld [vmem:[#allocation6] sm:$0xff]  ;;  %v358_v10 = vpack.c.bf16 %v64_v8, %v63_v7  ;;  %v48_v11 = vld [vmem:[#allocation6 + $0x8] sm:$0xff]  ;;  %v65_v12 = vld [vmem:[#allocation6 + $0x90] sm:$0xff]  ;;  %s312_s17 = sshll.u32 %s473_s16, 4  ;;  %s313_s17 = int_to_ptr.vmem [resolvable:$true] %s312_s17 }
  0x28   :  { %v82_v1 = vshrl.u32 %v81_v0, 7  ;;  %v86_v2 = vand.u32 127, %v81_v0  ;;  %v66_v13 = vld [vmem:[#allocation6 + $0x98] sm:$0xff]  ;;  %v360_v15 = vpack.c.bf16 %v48_v11, %v47_v9  ;;  %v49_v17 = vld [vmem:[#allocation6 + $0x10] sm:$0xff]  ;;  %v67_v19 = vld [vmem:[#allocation6 + $0xa0] sm:$0xff]  ;;  %s440_s18 = scalar_lea.vmem %s313_s17, 128  ;;  %p445_p3 = scmp.lt.s32.totalorder %s313_s17, %s313_s17 }
  0x29   :  { %v362_v16 = vpack.c.bf16 %v66_v13, %v65_v12  ;;  %v50_v18 = vld [vmem:[#allocation6 + $0x18] sm:$0xff]  ;;  %359 = vmatprep.subr.bf16.mxu0 %v358_v10  ;;  %v68_v21 = vld [vmem:[#allocation6 + $0xa8] sm:$0xff]  ;;  %v51_v22 = vld [vmem:[#allocation6 + $0x20] sm:$0xff]  ;;  %p441_p2 = scmp.ne.s32.totalorder %s313_s17, %s440_s18  ;;  %p446_p4 = scmp.lt.s32.totalorder %s440_s18, %s440_s18 }
  0x2a   :  { %v87_v3 = vadd.s32 128, %v86_v2  ;;  %v88_v4 = vmul.u32 256, %v82_v1  ;;  %v52_v23 = vld [vmem:[#allocation6 + $0x28] sm:$0xff]  ;;  %361 = vmatpush3.bf16.msra.mxu0 %v360_v15  ;;  %v364_v25 = vpack.c.bf16 %v50_v18, %v49_v17  ;;  %v69_v26 = vld [vmem:[#allocation6 + $0xb0] sm:$0xff]  ;;  %v70_v27 = vld [vmem:[#allocation6 + $0xb8] sm:$0xff]  ;;  %v366_v30 = vpack.c.bf16 %v68_v21, %v67_v19 }
  0x2b   :  { %v533_v28 = vld [vmem:[#allocation6 + $0x30] sm:$0xff]  ;;  %363 = vmatprep.subr.bf16.mxu0 %v362_v16  ;;  %v54_v31 = vld [vmem:[#allocation6 + $0x38] sm:$0xff]  ;;  %v535_v32 = vld [vmem:[#allocation6 + $0xc0] sm:$0xff]  ;;  %v368_v36 = vpack.c.bf16 %v52_v23, %v51_v22  ;;  %v370_v43 = vpack.c.bf16 %v70_v27, %v69_v26  ;;  %p447_p5 = por %p446_p4, %p445_p3 }
  0x2c   :  { %v90_v6 = vadd.s32 %v88_v4, %v87_v3  ;;  %v89_v20 = vadd.s32 %v88_v4, %v86_v2  ;;  %v72_v33 = vld [vmem:[#allocation6 + $0xc8] sm:$0xff]  ;;  %v537_v37 = vld [vmem:[#allocation6 + $0x40] sm:$0xff]  ;;  %v541_v39 = vld [vmem:[#allocation6 + $0xd0] sm:$0xff]  ;;  %v372_v50 = vpack.c.bf16 %v54_v31, %v533_v28 }
  0x2d   :  { %v539_v38 = vld [vmem:[#allocation6 + $0x48] sm:$0xff]  ;;  %v545_v44 = vld [vmem:[#allocation6 + $0xd8] sm:$0xff]  ;;  %v547_v45 = vld [vmem:[#allocation6 + $0x50] sm:$0xff]  ;;  %v374_v51 = vpack.c.bf16 %v72_v33, %v535_v32  ;;  %p448_p6 = pnand %p447_p5, %p441_p2 }
  0x2e   :  { %v94_v14 = vadd.s32 %v92_v5, %v90_v6  ;;  %v543_v40 = vadd.s32 %v92_v5, %v89_v20  ;;  %v549_v46 = vld [vmem:[#allocation6 + $0x58] sm:$0xff]  ;;  %365 = vmatpush3.bf16.msra.mxu0 %v364_v25  ;;  %v553_v52 = vld [vmem:[#allocation6 + $0xe0] sm:$0xff]  ;;  %v555_v53 = vld [vmem:[#allocation6 + $0xe8] sm:$0xff]  ;;  %v376_v56 = vpack.c.bf16 %v539_v38, %v537_v37  ;;  %v378_v62 = vpack.c.bf16 %v545_v44, %v541_v39 }
  0x2f   :  { %367 = vmatprep.subr.bf16.mxu0 %v366_v30  ;;  %v559_v57 = vld [vmem:[#allocation6 + $0x60] sm:$0xff]  ;;  %v561_v58 = vld [vmem:[#allocation6 + $0x68] sm:$0xff]  ;;  %v380_v63 = vpack.c.bf16 %v549_v46, %v547_v45  ;;  %v382_v2 = vpack.c.bf16 %v555_v53, %v553_v52 }
  0x30   :  { %v96_v24 = vadd.s32 2654435769, %v94_v14  ;;  %v122_v29 = vadd.s32 1013904242, %v94_v14  ;;  %v148_v35 = vadd.s32 3668340011, %v94_v14  ;;  %v384_v6 = vpack.c.bf16 %v561_v58, %v559_v57 }
  0x31   :  { %v174_v42 = vadd.s32 2027808484, %v94_v14  ;;  %v200_v49 = vadd.s32 387276957, %v94_v14  ;;  %v95_v9 = vadd.s32 2654435769, %v543_v40 }
  0x32   :  { %v98_v34 = vshrl.u32 %v96_v24, 16  ;;  %v124_v41 = vshrl.u32 %v122_v29, 16  ;;  %v150_v48 = vshrl.u32 %v148_v35, 16  ;;  %369 = vmatpush3.bf16.msra.mxu0 %v368_v36  ;;  %v121_v13 = vadd.s32 1013904242, %v543_v40 }
  0x33   :  { %v176_v55 = vshrl.u32 %v174_v42, 16  ;;  %v202_v61 = vshrl.u32 %v200_v49, 16  ;;  %371 = vmatprep.subr.bf16.mxu0 %v370_v43  ;;  %v97_v16 = vshrl.u32 %v95_v9, 16  ;;  %v147_v17 = vadd.s32 3668340011, %v543_v40 }
  0x34   :  { %v100_v47 = vxor.u32 %v98_v34, %v96_v24  ;;  %v126_v54 = vxor.u32 %v124_v41, %v122_v29  ;;  %v152_v60 = vxor.u32 %v150_v48, %v148_v35  ;;  %v123_v21 = vshrl.u32 %v121_v13, 16 }
  0x35   :  { %v178_v1 = vxor.u32 %v176_v55, %v174_v42  ;;  %v204_v5 = vxor.u32 %v202_v61, %v200_v49  ;;  %v99_v24 = vxor.u32 %v97_v16, %v95_v9  ;;  %v149_v25 = vshrl.u32 %v147_v17, 16  ;;  %v77_v49 = vld [vmem:[#allocation6 + $0xf0] sm:$0xff] }
  0x36   :  { %v102_v59 = vmul.u32 2146121005, %v100_v47  ;;  %v128_v0 = vmul.u32 2146121005, %v126_v54  ;;  %373 = vmatpush3.bf16.msra.mxu0 %v372_v50  ;;  %v125_v29 = vxor.u32 %v123_v21, %v121_v13  ;;  %v78_v50 = vld [vmem:[#allocation6 + $0xf8] sm:$0xff] }
  0x37   :  { %v154_v4 = vmul.u32 2146121005, %v152_v60  ;;  %v180_v8 = vmul.u32 2146121005, %v178_v1  ;;  %375 = vmatprep.subr.bf16.mxu0 %v374_v51  ;;  %v151_v33 = vxor.u32 %v149_v25, %v147_v17  ;;  %v61_v60 = vld [vmem:[#allocation6 + $0x70] sm:$0xff] }
  0x38   :  { %v104_v3 = vshrl.u32 %v102_v59, 15  ;;  %v130_v7 = vshrl.u32 %v128_v0, 15  ;;  %v206_v12 = vmul.u32 2146121005, %v204_v5  ;;  %v101_v32 = vmul.u32 2146121005, %v99_v24 }
  0x39   :  { %v156_v11 = vshrl.u32 %v154_v4, 15  ;;  %v182_v15 = vshrl.u32 %v180_v8, 15  ;;  %v127_v37 = vmul.u32 2146121005, %v125_v29  ;;  %v153_v42 = vmul.u32 2146121005, %v151_v33 }
  0x3a   :  { %v106_v10 = vxor.u32 %v104_v3, %v102_v59  ;;  %v132_v14 = vxor.u32 %v130_v7, %v128_v0  ;;  %v208_v20 = vshrl.u32 %v206_v12, 15  ;;  %377 = vmatpush3.bf16.msra.mxu0 %v376_v56  ;;  %v103_v41 = vshrl.u32 %v101_v32, 15  ;;  %v62_v7 = vld [vmem:[#allocation6 + $0x78] sm:$0xff] }
  0x3b   :  { %v158_v19 = vxor.u32 %v156_v11, %v154_v4  ;;  %v184_v23 = vxor.u32 %v182_v15, %v180_v8  ;;  %379 = vmatprep.subr.bf16.mxu0 %v378_v62  ;;  %v129_v48 = vshrl.u32 %v127_v37, 15  ;;  %v155_v59 = vshrl.u32 %v153_v42, 15 }
  0x3c   :  { %v108_v18 = vmul.u32 2221713035, %v106_v10  ;;  %v134_v22 = vmul.u32 2221713035, %v132_v14  ;;  %v210_v28 = vxor.u32 %v208_v20, %v206_v12  ;;  %v105_v55 = vxor.u32 %v103_v41, %v101_v32 }
  0x3d   :  { %v160_v27 = vmul.u32 2221713035, %v158_v19  ;;  %v186_v31 = vmul.u32 2221713035, %v184_v23  ;;  %v131_v56 = vxor.u32 %v129_v48, %v127_v37  ;;  %v472_v62 = vmov 0.0  }
  0x3e   :  { %v110_v26 = vshrl.u32 %v108_v18, 16  ;;  %v136_v30 = vshrl.u32 %v134_v22, 16  ;;  %v212_v36 = vmul.u32 2221713035, %v210_v28  ;;  %381 = vmatpush3.bf16.msra.mxu0 %v380_v63  ;;  %v157_v4 = vxor.u32 %v155_v59, %v153_v42 }
  0x3f   :  { %v162_v35 = vshrl.u32 %v160_v27, 16  ;;  %v188_v39 = vshrl.u32 %v186_v31, 16  ;;  %383 = vmatprep.subr.bf16.mxu0 %v382_v2  ;;  %v386_v5 = vpack.c.bf16 %v78_v50, %v77_v49  ;;  %v107_v46 = vmul.u32 2221713035, %v105_v55 }
  0x40   :  { %v112_v34 = vxor.u32 %v110_v26, %v108_v18  ;;  %v138_v38 = vxor.u32 %v136_v30, %v134_v22  ;;  %v214_v47 = vshrl.u32 %v212_v36, 16  ;;  %v133_v11 = vmul.u32 2221713035, %v131_v56 }
  0x41   :  { %v164_v44 = vxor.u32 %v162_v35, %v160_v27  ;;  %v190_v54 = vxor.u32 %v188_v39, %v186_v31  ;;  %v388_v52 = vpack.c.bf16 %v62_v7, %v61_v60  ;;  %v109_v2 = vshrl.u32 %v107_v46, 16  ;;  %v45_v60 = vld [vmem:[#allocation3] sm:$0xff] }
  0x42   :  { %v114_v43 = vand.u32 8388607, %v112_v34  ;;  %v140_v51 = vand.u32 8388607, %v138_v38  ;;  %v216_v0 = vxor.u32 %v214_v47, %v212_v36  ;;  %385 = vmatpush3.bf16.msra.mxu0 %v384_v6  ;;  %v159_v12 = vmul.u32 2221713035, %v157_v4 }
  0x43   :  { %v166_v61 = vand.u32 8388607, %v164_v44  ;;  %v192_v3 = vand.u32 8388607, %v190_v54  ;;  %387 = vmatprep.subr.bf16.mxu0 %v386_v5  ;;  %v135_v14 = vshrl.u32 %v133_v11, 16  ;;  %v111_v18 = vxor.u32 %v109_v2, %v107_v46  ;;  %v46_v6 = vld [vmem:[#allocation3 + $0x8] sm:$0xff] }
  0x44   :  { %vm116_vm0 = vcmp.ge.u32.totalorder %v114_v43, 838861  ;;  %vm142_vm1 = vcmp.ge.u32.totalorder %v140_v51, 1677722  ;;  %v218_v9 = vand.u32 8388607, %v216_v0  ;;  %v161_v19 = vshrl.u32 %v159_v12, 16 }
  0x45   :  { %v118_v1 = vsel %vm116_vm0, 1.1111112, %v472_v62  ;;  %v144_v8 = vsel %vm142_vm1, 1.25, %v472_v62  ;;  %vm168_vm2 = vcmp.ge.u32.totalorder %v166_v61, 2516582  ;;  %v137_v20 = vxor.u32 %v135_v14, %v133_v11 }
  0x46   :  { %v146_v10 = vadd.f32 %v144_v8, %v118_v1  ;;  %v170_v45 = vsel %vm168_vm2, 1.4285715, %v472_v62  ;;  %vm194_vm3 = vcmp.ge.u32.totalorder %v192_v3, 3355443  ;;  %vm220_vm4 = vcmp.ge.u32.totalorder %v218_v9, 4194304  ;;  %389 = vmatpush3.bf16.msra.mxu0 %v388_v52 }
  0x47   :  { %v196_v63 = vsel %vm194_vm3, 1.6666666, %v472_v62  ;;  %v222_v13 = vsel %vm220_vm4, 2.0, %v472_v62  ;;  %v173_v15 = vadd.s32 2027808484, %v543_v40  ;;  %v163_v24 = vxor.u32 %v161_v19, %v159_v12 }
  0x48   :  { %v172_v53 = vadd.f32 %v170_v45, %v146_v10  ;;  %v199_v16 = vadd.s32 387276957, %v543_v40  ;;  %v113_v58 = vand.u32 8388607, %v111_v18  ;;  %v139_v23 = vand.u32 8388607, %v137_v20 }
  0x49   :  { %v175_v21 = vshrl.u32 %v173_v15, 16  ;;  %v165_v40 = vand.u32 8388607, %v163_v24  ;;  %v322_v1 = vld [vmem:[%s613_s3] ss:$0 sm:$0xff] }
  0x4a   :  { %v198_v17 = vadd.f32 %v196_v63, %v172_v53  ;;  %v201_v22 = vshrl.u32 %v199_v16, 16  ;;  %vm115_vm5 = vcmp.ge.u32.totalorder %v113_v58, 838861  ;;  %vm141_vm6 = vcmp.ge.u32.totalorder %v139_v23, 1677722 }
  0x4b   :  { %v177_v25 = vxor.u32 %v175_v21, %v173_v15  ;;  %v117_v34 = vsel %vm115_vm5, 1.1111112, %v472_v62  ;;  %v143_v35 = vsel %vm141_vm6, 1.25, %v472_v62  ;;  %vm167_vm7 = vcmp.ge.u32.totalorder %v165_v40, 2516582 }
  0x4c   :  { %v224_v57 = vadd.f32 %v222_v13, %v198_v17  ;;  %v203_v26 = vxor.u32 %v201_v22, %v199_v16  ;;  %v145_v39 = vadd.f32 %v143_v35, %v117_v34  ;;  %v169_v42 = vsel %vm167_vm7, 1.4285715, %v472_v62 }
  0x4d   :  { %v179_v28 = vmul.u32 2146121005, %v177_v25 }
  0x4e   :  { %v226_v27 = vmul.f32 0.2, %v224_v57  ;;  %v205_v30 = vmul.u32 2146121005, %v203_v26  ;;  %v171_v48 = vadd.f32 %v169_v42, %v145_v39 }
  0x4f   :  { %v181_v31 = vshrl.u32 %v179_v28, 15 }
  0x50   :  { %v228_v29 = vmul.f32 %v226_v27, %v46_v6  ;;  %v207_v32 = vshrl.u32 %v205_v30, 15 }
  0x51   :  { %v183_v33 = vxor.u32 %v181_v31, %v179_v28 }
  0x52   :  { %299 = vmatprep.mubr.f32.mxu0 %v228_v29  ;;  %v209_v36 = vxor.u32 %v207_v32, %v205_v30 }
  0x53   :  { %v185_v37 = vmul.u32 2221713035, %v183_v33 }
  0x54   :  { %v211_v38 = vmul.u32 2221713035, %v209_v36 }
  0x55   :  { %v187_v41 = vshrl.u32 %v185_v37, 16 }
  0x56   :  { %v213_v43 = vshrl.u32 %v211_v38, 16 }
  0x57   :  { %v189_v44 = vxor.u32 %v187_v41, %v185_v37 }
  0x58   :  { %v215_v47 = vxor.u32 %v213_v43, %v211_v38 }
  0x59   :  { %v191_v49 = vand.u32 8388607, %v189_v44 }
  0x5a   :  { %v217_v50 = vand.u32 8388607, %v215_v47 }
  0x5b   :  { %vm193_vm8 = vcmp.ge.u32.totalorder %v191_v49, 3355443 }
  0x5c   :  { %v195_v51 = vsel %vm193_vm8, 1.6666666, %v472_v62  ;;  %vm219_vm9 = vcmp.ge.u32.totalorder %v217_v50, 4194304 }
  0x5d   :  { %v197_v54 = vadd.f32 %v195_v51, %v171_v48  ;;  %v221_v55 = vsel %vm219_vm9, 2.0, %v472_v62 }
  0x5f   :  { %v223_v59 = vadd.f32 %v221_v55, %v197_v54 }
  0x61   :  { %v225_v61 = vmul.f32 0.2, %v223_v59 }
  0x63   :  { %v227_v0 = vmul.f32 %v225_v61, %v45_v60 }
  0x65   :  { %300 = vmatmul.mubr.f32.vlgmr.msra.gmra.mrb[0].mxu0 %v227_v0 }
 0x138   :  { %v355_v56 = vpop.f32.mrb[0].mxu0 }
 0x139   :  { %v356_v3 = vpop.f32.mrb[1].mxu0 }
 0x13a   :  { %v357_v4 = vadd.f32 %v356_v3, %v355_v56 }
 0x13c   :  { %v302_v5 = vadd.f32 %v357_v4, %v322_v1 }
 0x13e   :  { %305 = vst [vmem:[#allocation8] sm:$0xff] %v302_v5 }
 0x13f   :  { %451 = shalt.err (!%p448_p6)
}
 0x140   :  { %s452_s21 = scalar_lea.hbm %s614_s4, 128 }
 0x141   :  { %p453_p7 = scmp.ne.s32.totalorder %s614_s4, %s452_s21  ;;  %p456_p8 = scmp.lt.u32.totalorder %s452_s21, %s614_s4 }
 0x143   :  { %p458_p9 = pnand %p456_p8, %p453_p7 }
 0x145   :  { %461 = shalt.err (!%p458_p9)
}
 0x146   :  { %315 = dma.vmem_to_hbm [thread:$0]  %s313_s17, 128, %s614_s4, [#allocation5]  }
 0x147   :  { %466 = dma.done.wait [#allocation5], 128  }
 0x148   :  { %467 = vsyncadd [#allocation5], 4294967168 }
 0x149   :  { %319 = vsyncpa [#allocation4], 1 }
 0x14a   :  { %320 = vsyncpa [#allocation7], 1 }
 0x14b   :  { %321 = vsyncpa [#allocation5], 1 }

</bundles_post_ra>
